<compile_context>
chip_gen: v5e
topology: v5e:2x2
jax: 0.10.0
libtpu: 0.0.40
codegen_flags: <defaults>
</compile_context>

<pallas_src>
import functools
import math

import jax
import jax.numpy as jnp
from jax.experimental import pallas as pl
from jax.experimental.pallas import tpu as pltpu


def _ohem_ce_kernel(logits_ref, labels_ref, sum_ref, cnt_ref, *,
                    thresh, ignore_lb, hw, tiles_per_chunk, exp_bf16):
    t = pl.program_id(2)                              # innermost ("arbitrary")
    tile = labels_ref.shape[-1]
    p_global = pl.program_id(1) * tiles_per_chunk + t  # global pixel-tile index

    @pl.when(t == 0)
    def _():
        sum_ref[...] = jnp.zeros_like(sum_ref)
        cnt_ref[...] = jnp.zeros_like(cnt_ref)

    x = logits_ref[...].astype(jnp.float32)           # (C, tile)
    labels = labels_ref[...].astype(jnp.int32)        # (1, tile), any int dtype in

    # numerically stable log-sum-exp over the class (sublane) axis
    m = jnp.max(x, axis=0, keepdims=True)
    xm = x - m
    if exp_bf16:
        # Optional EUP throughput win on v6e/v7x (bf16 EUP); off by default —
        # validate accuracy near the OHEM threshold before enabling.
        e = jnp.exp(xm.astype(jnp.bfloat16)).astype(jnp.float32)
    else:
        e = jnp.exp(xm)
    lse = m + jnp.log(jnp.sum(e, axis=0, keepdims=True))

    # "gather" the target-class logit via an iota compare (no dynamic gather on TPU)
    cls = jax.lax.broadcasted_iota(jnp.int32, x.shape, 0)
    x_lab = jnp.sum(jnp.where(cls == labels, x, 0.0), axis=0, keepdims=True)

    # Mask ignored pixels and the ragged tail of the last pixel tile.
    # NOTE: this masking must stay *before* the sum/cnt accumulation — it is
    # what neutralizes garbage/NaN lanes from the padded tail.
    lane = jax.lax.broadcasted_iota(jnp.int32, labels.shape, 1)
    in_bounds = (p_global * tile + lane) < hw
    valid = jnp.logical_and(labels != ignore_lb, in_bounds)
    loss = jnp.where(valid, lse - x_lab, 0.0)          # (1, tile)

    # lane-wise partial stats; zero-loss (ignored / tail) lanes never count
    # because thresh = -log(t) > 0 for t in (0, 1).
    above = loss > thresh
    sum_ref[...] += jnp.where(above, loss, 0.0)
    cnt_ref[...] += above.astype(jnp.float32)


def ohem_ce_loss(logits, labels, *, thresh=0.7, n_min=64, ignore_lb=255,
                 tile=None, vmem_budget_bytes=24 << 20, logits_buffers=2,
                 exp_bf16=False):
    """OHEM cross-entropy matching PyTorch OhemCELoss.forward.

    logits: (N, C, H, W) float (f32 or bf16, upcast in-kernel).
    labels: (N, H, W) integer (uint8 / int16 / int32 accepted without a copy).
    Returns the scalar loss.
    """
    if not (0.0 < thresh < 1.0):
        raise ValueError("thresh must lie in (0, 1) so that -log(thresh) > 0")
    N, C, H, W = logits.shape
    HW = H * W
    thresh_val = float(-math.log(thresh))

    # Keep narrow label dtypes end-to-end (1-2 B/pixel of HBM traffic instead
    # of 4); only fall back to int32 for unsupported dtypes (e.g. int64/bool).
    if not any(labels.dtype == d for d in
               (jnp.uint8, jnp.int8, jnp.uint16, jnp.int16, jnp.uint32, jnp.int32)):
        labels = labels.astype(jnp.int32)
    logit_bytes = jnp.dtype(logits.dtype).itemsize
    label_bytes = jnp.dtype(labels.dtype).itemsize

    # Free reshapes (no HBM copies): NCHW -> (N, C, HW), labels -> (N, 1, HW).
    logits_3d = logits.reshape(N, C, HW)
    labels_3d = labels.reshape(N, 1, HW)

    # ---- pixel-tile selection -------------------------------------------
    # Large tiles amortize the ~0.35 us per-grid-step overhead.  Derive from a
    # VMEM budget: double-buffered logits+labels blocks + 2 f32 accumulators.
    # Cap at 64K pixels (C~19 f32 => ~11 MiB resident), which fits every
    # generation once we raise vmem_limit_bytes (v5e scoped default is only
    # 16 MiB; v7x physical VMEM is 64 MiB so don't scale blindly with C).
    hw_pad = -(-HW // 128) * 128
    if tile is None:
        per_pixel = 2 * (C * logit_bytes + label_bytes) + 2 * 4
        tile = vmem_budget_bytes // per_pixel
    tile = min(int(tile), 65536, hw_pad)
    tile = max(128, (tile // 128) * 128)

    total_tiles = pl.cdiv(HW, tile)
    # Second *parallel* grid axis over pixel chunks so both v7x TensorCores
    # stay busy at small / odd batch (neutral on single-TC v5e/v6e).
    n_chunks = 2 if (total_tiles % 2 == 0 and total_tiles >= 2) else 1
    tiles_per_chunk = total_tiles // n_chunks

    resident_bytes = tile * (2 * (C * logit_bytes + label_bytes) + 2 * 2 * 4)
    vmem_limit = int(min(96 << 20, max(32 << 20, resident_bytes + (8 << 20))))

    logits_spec_kwargs = {}
    if logits_buffers > 2:
        # Optional deeper pipelining; keep 2 unless a profile shows exposed DMA.
        logits_spec_kwargs["pipeline_mode"] = pl.Buffered(int(logits_buffers))

    kernel = functools.partial(_ohem_ce_kernel, thresh=thresh_val,
                               ignore_lb=ignore_lb, hw=HW,
                               tiles_per_chunk=tiles_per_chunk,
                               exp_bf16=exp_bf16)

    sum_out, cnt_out = pl.pallas_call(
        kernel,
        out_shape=(jax.ShapeDtypeStruct((N, n_chunks, tile), jnp.float32),
                   jax.ShapeDtypeStruct((N, n_chunks, tile), jnp.float32)),
        grid_spec=pltpu.PrefetchScalarGridSpec(
            num_scalar_prefetch=0,
            grid=(N, n_chunks, tiles_per_chunk),
            in_specs=[
                pl.BlockSpec((None, C, tile),
                             lambda n, c, t: (n, 0, c * tiles_per_chunk + t),
                             **logits_spec_kwargs),
                pl.BlockSpec((None, 1, tile),
                             lambda n, c, t: (n, 0, c * tiles_per_chunk + t)),
            ],
            out_specs=(
                pl.BlockSpec((None, 1, tile), lambda n, c, t: (n, c, 0)),
                pl.BlockSpec((None, 1, tile), lambda n, c, t: (n, c, 0)),
            ),
        ),
        compiler_params=pltpu.CompilerParams(
            dimension_semantics=("parallel", "parallel", "arbitrary"),
            vmem_limit_bytes=vmem_limit),
    )(logits_3d, labels_3d)

    thr_sum = jnp.sum(sum_out)
    # Per-lane counts are <= tiles_per_chunk (exactly representable in f32);
    # reduce to int32 so the global count stays exact for huge N*HW.
    thr_cnt = jnp.sum(cnt_out.astype(jnp.int32))

    # loss_sorted_desc[n_min] > thresh  <=>  count(loss > thresh) > n_min, so
    # the per-pixel-loss recompute + top_k only runs in the rare fallback
    # branch (lax.cond executes a single branch at runtime under jit).
    # TODO(synk): the descending sort / n_min-th-largest selection itself has
    # no clean Pallas TPU equivalent; it is done with jax.lax.top_k in JAX.
    def _mean_above(_):
        return thr_sum / thr_cnt.astype(jnp.float32)

    def _mean_topk(_):
        x = logits_3d.astype(jnp.float32)                       # (N, C, HW)
        lse = jax.scipy.special.logsumexp(x, axis=1)            # (N, HW)
        lab = labels.reshape(N, HW).astype(jnp.int32)
        valid = lab != ignore_lb
        safe = jnp.where(valid, lab, 0)
        xl = jnp.take_along_axis(x, safe[:, None, :], axis=1)[:, 0, :]
        per_pix = jnp.where(valid, lse - xl, 0.0).reshape(-1)
        topk = jax.lax.top_k(per_pix, n_min)[0]
        return jnp.sum(topk) / jnp.float32(n_min)

    return jax.lax.cond(thr_cnt > n_min, _mean_above, _mean_topk, None)


def _ref_ohem(logits, labels, thresh, n_min, ignore_lb):
    """Pure-JAX reference of the PyTorch forward semantics."""
    N, C, H, W = logits.shape
    x = jnp.transpose(logits, (0, 2, 3, 1)).reshape(-1, C).astype(jnp.float32)
    lab = labels.reshape(-1).astype(jnp.int32)
    lse = jax.scipy.special.logsumexp(x, axis=-1)
    valid = lab != ignore_lb
    xl = jnp.take_along_axis(x, jnp.where(valid, lab, 0)[:, None], axis=1)[:, 0]
    per_pix = jnp.where(valid, lse - xl, 0.0)
    srt = jnp.sort(per_pix)[::-1]
    tval = -math.log(thresh)
    if float(srt[n_min]) > tval:
        return float(jnp.mean(srt[srt > tval]))
    return float(jnp.mean(srt[:n_min]))


if __name__ == "__main__":
    key = jax.random.PRNGKey(0)
    k1, k2, k3, k4 = jax.random.split(key, 4)
    N, C, H, W = 2, 4, 16, 16
    n_min = (N * H * W) // 8  # 64

    labels = jax.random.randint(k2, (N, H, W), 0, C)
    ignore_mask = jax.random.bernoulli(k3, 0.1, (N, H, W))
    labels = jnp.where(ignore_mask, 255, labels).astype(jnp.int32)

    loss_fn = jax.jit(functools.partial(ohem_ce_loss, thresh=0.7, n_min=n_min,
                                        ignore_lb=255))

    # Case 1: random logits -> most losses above -log(0.7) -> threshold branch.
    logits = jax.random.normal(k1, (N, C, H, W), dtype=jnp.float32)
    out1 = float(jax.block_until_ready(loss_fn(logits, labels)))
    ref1 = _ref_ohem(logits, labels, 0.7, n_min, 255)
    assert abs(out1 - ref1) < 1e-4 * max(1.0, abs(ref1)), (out1, ref1)

    # Case 2: sharply peaked (correct-class) logits -> losses ~0 -> top-k branch.
    onehot = jax.nn.one_hot(jnp.where(labels == 255, 0, labels), C,
                            axis=1, dtype=jnp.float32)          # (N, C, H, W)
    logits_sharp = 8.0 * onehot + 0.1 * jax.random.normal(
        k4, (N, C, H, W), dtype=jnp.float32)
    out2 = float(jax.block_until_ready(loss_fn(logits_sharp, labels)))
    ref2 = _ref_ohem(logits_sharp, labels, 0.7, n_min, 255)
    assert abs(out2 - ref2) < 1e-4 * max(1.0, abs(ref2)), (out2, ref2)

    print("KERNEL_OK")
</pallas_src>

<mosaic_0001>
module attributes {stable_mosaic.version = 11 : i64} {
  func.func @_ohem_ce_kernel(%arg0: i32, %arg1: i32, %arg2: i32, %arg3: memref<1x4x256xf32, #tpu.memory_space<vmem>>, %arg4: memref<1x1x256xi32, #tpu.memory_space<vmem>>, %arg5: memref<1x1x256xf32, #tpu.memory_space<vmem>>, %arg6: memref<1x1x256xf32, #tpu.memory_space<vmem>>) attributes {dimension_semantics = [#tpu.dimension_semantics<parallel>, #tpu.dimension_semantics<parallel>, #tpu.dimension_semantics<arbitrary>], iteration_bounds = array<i64: 2, 1, 1>, scalar_prefetch = 0 : i64, scratch_operands = 0 : i64, tpu.core_type = #tpu.core_type<tc>, window_params = [{transform_indices = @transform_0, window_bounds = array<i64: 1, 4, 256>}, {transform_indices = @transform_1, window_bounds = array<i64: 1, 1, 256>}, {transform_indices = @transform_2, window_bounds = array<i64: 1, 1, 256>}, {transform_indices = @transform_3, window_bounds = array<i64: 1, 1, 256>}]} {
    %c1_i32 = arith.constant 1 : i32
    %0 = arith.muli %arg1, %c1_i32 : i32
    %1 = arith.addi %0, %arg2 : i32
    %c0_i32 = arith.constant 0 : i32
    %2 = arith.cmpi eq, %arg2, %c0_i32 : i32
    %3 = arith.extui %2 : i1 to i32
    %c0_i32_0 = arith.constant 0 : i32
    %4 = arith.cmpi ne, %3, %c0_i32_0 : i32
    scf.if %4 {
      %cst_25 = arith.constant 0.000000e+00 : f32
      %55 = vector.broadcast %cst_25 : f32 to vector<1x256xf32>
      %c0_26 = arith.constant 0 : index
      %c0_27 = arith.constant 0 : index
      %c0_28 = arith.constant 0 : index
      %56 = vector.load %arg5[%c0_26, %c0_27, %c0_28] : memref<1x1x256xf32, #tpu.memory_space<vmem>>, vector<1x1x256xf32>
      %57 = vector.shape_cast %56 : vector<1x1x256xf32> to vector<1x256xf32>
      %58 = vector.shape_cast %55 : vector<1x256xf32> to vector<1x1x256xf32>
      tpu.vector_store %arg5[%c0_26, %c0_27, %c0_28], %58 {strides = array<i32>} : memref<1x1x256xf32, #tpu.memory_space<vmem>>, vector<1x1x256xf32>,
      %cst_29 = arith.constant 0.000000e+00 : f32
      %59 = vector.broadcast %cst_29 : f32 to vector<1x256xf32>
      %c0_30 = arith.constant 0 : index
      %c0_31 = arith.constant 0 : index
      %c0_32 = arith.constant 0 : index
      %60 = vector.load %arg6[%c0_30, %c0_31, %c0_32] : memref<1x1x256xf32, #tpu.memory_space<vmem>>, vector<1x1x256xf32>
      %61 = vector.shape_cast %60 : vector<1x1x256xf32> to vector<1x256xf32>
      %62 = vector.shape_cast %59 : vector<1x256xf32> to vector<1x1x256xf32>
      tpu.vector_store %arg6[%c0_30, %c0_31, %c0_32], %62 {strides = array<i32>} : memref<1x1x256xf32, #tpu.memory_space<vmem>>, vector<1x1x256xf32>,
    } else {
    }
    %c0 = arith.constant 0 : index
    %c0_1 = arith.constant 0 : index
    %c0_2 = arith.constant 0 : index
    %5 = vector.load %arg3[%c0, %c0_1, %c0_2] : memref<1x4x256xf32, #tpu.memory_space<vmem>>, vector<1x4x256xf32>
    %6 = vector.shape_cast %5 : vector<1x4x256xf32> to vector<4x256xf32>
    %c0_3 = arith.constant 0 : index
    %c0_4 = arith.constant 0 : index
    %c0_5 = arith.constant 0 : index
    %7 = vector.load %arg4[%c0_3, %c0_4, %c0_5] : memref<1x1x256xi32, #tpu.memory_space<vmem>>, vector<1x1x256xi32>
    %8 = vector.shape_cast %7 : vector<1x1x256xi32> to vector<1x256xi32>
    %cst = arith.constant dense<0xFF800000> : vector<256xf32>
    %9 = vector.multi_reduction <maximumf>, %6, %cst [0] : vector<4x256xf32> to vector<256xf32>
    %10 = vector.shape_cast %9 : vector<256xf32> to vector<1x256xf32>
    %11 = vector.broadcast %10 : vector<1x256xf32> to vector<4x256xf32>
    %12 = arith.subf %6, %11 : vector<4x256xf32>
    %13 = math.exp %12 : vector<4x256xf32>
    %cst_6 = arith.constant dense<0.000000e+00> : vector<256xf32>
    %14 = vector.multi_reduction <add>, %13, %cst_6 [0] : vector<4x256xf32> to vector<256xf32>
    %15 = vector.shape_cast %14 : vector<256xf32> to vector<1x256xf32>
    %16 = math.log %15 : vector<1x256xf32>
    %17 = arith.addf %10, %16 : vector<1x256xf32>
    %18 = tpu.iota {dimensions = array<i32: 0>} : vector<4x256xi32>
    %19 = vector.broadcast %8 : vector<1x256xi32> to vector<4x256xi32>
    %20 = arith.cmpi eq, %18, %19 : vector<4x256xi32>
    %cst_7 = arith.constant 0.000000e+00 : f32
    %21 = vector.broadcast %cst_7 : f32 to vector<4x256xf32>
    %22 = arith.select %20, %6, %21 : vector<4x256xi1>, vector<4x256xf32>
    %cst_8 = arith.constant dense<0.000000e+00> : vector<256xf32>
    %23 = vector.multi_reduction <add>, %22, %cst_8 [0] : vector<4x256xf32> to vector<256xf32>
    %24 = vector.shape_cast %23 : vector<256xf32> to vector<1x256xf32>
    %25 = tpu.iota {dimensions = array<i32: 1>} : vector<1x256xi32>
    %c256_i32 = arith.constant 256 : i32
    %26 = arith.muli %1, %c256_i32 : i32
    %27 = vector.broadcast %26 : i32 to vector<1x256xi32>
    %28 = arith.addi %27, %25 : vector<1x256xi32>
    %c256_i32_9 = arith.constant 256 : i32
    %29 = vector.broadcast %c256_i32_9 : i32 to vector<1x256xi32>
    %30 = arith.cmpi slt, %28, %29 : vector<1x256xi32>
    %c255_i32 = arith.constant 255 : i32
    %31 = vector.broadcast %c255_i32 : i32 to vector<1x256xi32>
    %32 = arith.cmpi ne, %8, %31 : vector<1x256xi32>
    %33 = arith.andi %32, %30 : vector<1x256xi1>
    %34 = arith.subf %17, %24 : vector<1x256xf32>
    %cst_10 = arith.constant 0.000000e+00 : f32
    %35 = vector.broadcast %cst_10 : f32 to vector<1x256xf32>
    %36 = arith.select %33, %34, %35 : vector<1x256xi1>, vector<1x256xf32>
    %cst_11 = arith.constant 0.356674939 : f32
    %37 = vector.broadcast %cst_11 : f32 to vector<1x256xf32>
    %38 = arith.cmpf ogt, %36, %37 : vector<1x256xf32>
    %c0_12 = arith.constant 0 : index
    %c0_13 = arith.constant 0 : index
    %c0_14 = arith.constant 0 : index
    %39 = vector.load %arg5[%c0_12, %c0_13, %c0_14] : memref<1x1x256xf32, #tpu.memory_space<vmem>>, vector<1x1x256xf32>
    %40 = vector.shape_cast %39 : vector<1x1x256xf32> to vector<1x256xf32>
    %cst_15 = arith.constant 0.000000e+00 : f32
    %41 = vector.broadcast %cst_15 : f32 to vector<1x256xf32>
    %42 = arith.select %38, %36, %41 : vector<1x256xi1>, vector<1x256xf32>
    %43 = arith.addf %40, %42 : vector<1x256xf32>
    %c0_16 = arith.constant 0 : index
    %c0_17 = arith.constant 0 : index
    %c0_18 = arith.constant 0 : index
    %44 = vector.load %arg5[%c0_16, %c0_17, %c0_18] : memref<1x1x256xf32, #tpu.memory_space<vmem>>, vector<1x1x256xf32>
    %45 = vector.shape_cast %44 : vector<1x1x256xf32> to vector<1x256xf32>
    %46 = vector.shape_cast %43 : vector<1x256xf32> to vector<1x1x256xf32>
    tpu.vector_store %arg5[%c0_16, %c0_17, %c0_18], %46 {strides = array<i32>} : memref<1x1x256xf32, #tpu.memory_space<vmem>>, vector<1x1x256xf32>,
    %c0_19 = arith.constant 0 : index
    %c0_20 = arith.constant 0 : index
    %c0_21 = arith.constant 0 : index
    %47 = vector.load %arg6[%c0_19, %c0_20, %c0_21] : memref<1x1x256xf32, #tpu.memory_space<vmem>>, vector<1x1x256xf32>
    %48 = vector.shape_cast %47 : vector<1x1x256xf32> to vector<1x256xf32>
    %49 = arith.extui %38 : vector<1x256xi1> to vector<1x256xi32>
    %50 = arith.sitofp %49 : vector<1x256xi32> to vector<1x256xf32>
    %51 = arith.addf %48, %50 : vector<1x256xf32>
    %c0_22 = arith.constant 0 : index
    %c0_23 = arith.constant 0 : index
    %c0_24 = arith.constant 0 : index
    %52 = vector.load %arg6[%c0_22, %c0_23, %c0_24] : memref<1x1x256xf32, #tpu.memory_space<vmem>>, vector<1x1x256xf32>
    %53 = vector.shape_cast %52 : vector<1x1x256xf32> to vector<1x256xf32>
    %54 = vector.shape_cast %51 : vector<1x256xf32> to vector<1x1x256xf32>
    tpu.vector_store %arg6[%c0_22, %c0_23, %c0_24], %54 {strides = array<i32>} : memref<1x1x256xf32, #tpu.memory_space<vmem>>, vector<1x1x256xf32>,
    return
  }
  func.func @transform_0(%arg0: i32, %arg1: i32, %arg2: i32) -> (i32, i32, i32) {
    %c1_i32 = arith.constant 1 : i32
    %0 = arith.muli %arg1, %c1_i32 : i32
    %1 = arith.addi %0, %arg2 : i32
    %c0_i32 = arith.constant 0 : i32
    %c0_i32_0 = arith.constant 0 : i32
    return %arg0, %c0_i32, %1 : i32, i32, i32
  }
  func.func @transform_1(%arg0: i32, %arg1: i32, %arg2: i32) -> (i32, i32, i32) {
    %c1_i32 = arith.constant 1 : i32
    %0 = arith.muli %arg1, %c1_i32 : i32
    %1 = arith.addi %0, %arg2 : i32
    %c0_i32 = arith.constant 0 : i32
    %c0_i32_0 = arith.constant 0 : i32
    return %arg0, %c0_i32, %1 : i32, i32, i32
  }
  func.func @transform_2(%arg0: i32, %arg1: i32, %arg2: i32) -> (i32, i32, i32) {
    %c0_i32 = arith.constant 0 : i32
    %c0_i32_0 = arith.constant 0 : i32
    return %arg0, %arg1, %c0_i32 : i32, i32, i32
  }
  func.func @transform_3(%arg0: i32, %arg1: i32, %arg2: i32) -> (i32, i32, i32) {
    %c0_i32 = arith.constant 0 : i32
    %c0_i32_0 = arith.constant 0 : i32
    return %arg0, %arg1, %c0_i32 : i32, i32, i32
  }
}

</mosaic_0001>

<bundles_post_ra>
// kernel: ohem_ce_loss.1
= control target key start
LH: loop header
LB: loop body
LE: loop exit
PB: predicated region body
PF: predicated region fallthrough
CT: control target
= control target key end

     0   :  { %s656_s12 = smov 0   ;;  %s658_s13 = smov 0   ;;  %s737_s0 = inlined_call_operand.vmem [shape: f32[2,4,256], index: 0, kind: input, shape index: {}]   ;;  %s738_s1 = inlined_call_operand.vmem [shape: s32[2,1,256], index: 1, kind: input, shape index: {}]   ;;  %s739_s2 = inlined_call_operand.vmem [shape: f32[2,1,256], index: 2, kind: output, shape index: {0}]   ;;  %s740_s3 = inlined_call_operand.vmem [shape: f32[2,1,256], index: 3, kind: output, shape index: {1}]  }
   0x1   :  { %s660_s14 = smov 0  }
   0x2 LB: > { %s33_s15 = sadd.s32 1, %s628_s13  ;;  %p568_p0 = scmp.ge.s32.totalorder %s632_s14, 1  ;;  %s632_s14 = sphi %s660_s14, %s14_s14   ;;  %s628_s13 = sphi %s658_s13, %s744_s13   ;;  %s624_s12 = sphi %s656_s12, %s743_s12  }
   0x3   : > { %p35_p1 = scmp.ge.s32.totalorder %s33_s15, 2  ;;  %p194_p2 = scmp.lt.s32.totalorder %s632_s14, 3 }
   0x5   : > { %s746_s15 = smov (%p35_p1, %s33_s15), 0  ;;  %p195_p3 = pnand %p568_p0, %p194_p2 }
   0x6   : > { %p245_p4 = scmp.lt.s32.totalorder (!%p195_p3), %s624_s12, 1 }
   0x7   : > { %198 = sbr.rel (%p195_p3) target bundleno = 96 (0x60), region = 28 }
   0xc   : > { %s748_s12 = smov (!%p245_p4, %s624_s12), 1  ;;  %vm301_vm0 = vcmask 1043456   ;;  %v287_v19 = vlaneseq  ;;  %v634_v23 = vmov 0.0   ;;  %v635_v59 = vmov 1  }
   0xd   : > { %s577_s16 = sshll.u32 %s748_s12, 3  ;;  %s571_s20 = sshll.u32 %s748_s12, 1  ;;  %v389_v60 = vrot.slane %v635_v59, 7  ;;  %vm390_vm4 = vcmask 1040384  }
   0xe   : > { %s252_s19 = scalar_lea.vmem %s737_s0, %s577_s16  ;;  %s689_s23 = scalar_lea.vmem %s739_s2, %s571_s20  ;;  %vm696_vm1 = vcmp.lt.s32.totalorder %v287_v19, 256  ;;  %v351_v30 = vshrl.u32 %v287_v19, 7 }
   0xf   : > { %v293_v0 = vld [vmem:[%s252_s19] sm:$0xff]  ;;  %s694_s26 = scalar_lea.vmem %s740_s3, %s571_s20  ;;  %291 = vst.msk [vmem:[%s689_s23] sm:$0x3] %vm696_vm1, %v634_v23  ;;  %s263_s29 = scalar_lea.vmem %s738_s1, %s571_s20 }
  0x10   : > { %296 = vst [vmem:[#allocation1] ss:$2 sm:$0xff] %v293_v0  ;;  %v294_v25 = vld [vmem:[%s263_s29] sm:$0x3] }
  0x11   : > { %292 = vst.msk [vmem:[%s694_s26] sm:$0x3] %vm696_vm1, %v634_v23  ;;  %v352_v33 = vperm.slane %v294_v25, 0  ;;  %v353_v34 = vperm.slane %v294_v25, 1  ;;  %vm386_vm5 = vcmp.ne.s32.totalorder %v294_v25, 255 }
  0x13   : > { %vm354_vm2 = vcmp.eq.s32.totalorder %v351_v30, %v352_v33  ;;  %vm355_vm3 = vcmp.eq.s32.totalorder %v351_v30, %v353_v34 }
  0x17   : > { %v297_v1 = vld.sshfl [vmem:[#allocation1] sm:$0xff pattern:$0x75316420]  ;;  %v298_v2 = vld.sshfl [vmem:[#allocation1 + $0x8] sm:$0xff pattern:$0x75316420] }
  0x18   : > { %v302_v3 = vsel %vm301_vm0, %v297_v1, -inf  ;;  %v309_v4 = vsel %vm301_vm0, %v298_v2, -inf }
  0x19   : > { %v303_v5 = vrot.slane %v302_v3, 4  ;;  %v310_v6 = vrot.slane %v309_v4, 4 }
  0x1b   : > { %v304_v7 = vmax.f32 %v302_v3, %v303_v5  ;;  %v311_v8 = vmax.f32 %v309_v4, %v310_v6  ;;  %v391_v3 = vsel %vm390_vm4, 1, %v389_v60 }
  0x1c   : > { %vm392_vm6 = vcmp.ne.s32.totalorder %v391_v3, 0 }
  0x1d   : > { %v305_v9 = vrot.slane %v304_v7, 2  ;;  %v312_v10 = vrot.slane %v311_v8, 2  ;;  %vm393_vm7 = vmand %vm386_vm5, %vm392_vm6 }
  0x1f   : > { %v306_v11 = vmax.f32 %v304_v7, %v305_v9  ;;  %v313_v12 = vmax.f32 %v311_v8, %v312_v10 }
  0x21   : > { %v307_v13 = vrot.slane %v306_v11, 1  ;;  %v314_v14 = vrot.slane %v313_v12, 1 }
  0x23   : > { %v679_v15 = vmax.f32 %v313_v12, %v314_v14  ;;  %v681_v16 = vmax.f32 %v306_v11, %v307_v13  ;;  %v403_v13 = vld [vmem:[%s689_s23] sm:$0x3] }
  0x24   : > { %v411_v14 = vld [vmem:[%s694_s26] sm:$0x3] }
  0x25   : > { %v318_v17 = vrot.slane %v679_v15, 4 }
  0x27   : > { %v319_v18 = vsel %vm301_vm0, %v681_v16, %v318_v17 }
  0x28   : > { %v321_v20 = vsub.f32 %v293_v0, %v319_v18 }
  0x2a   : > { %v322_v22 = vmul.f32 1.442695, %v321_v20 }
  0x2c   : > { %604 = vpow2.f32 %v322_v22 }
  0x32   : > { %v605_v24 = vpop.eup %604 }
  0x33   : > { %325 = vst [vmem:[#allocation1] ss:$2 sm:$0xff] %v605_v24 }
  0x3a   : > { %v326_v26 = vld.sshfl [vmem:[#allocation1] sm:$0xff pattern:$0x75316420]  ;;  %v327_v27 = vld.sshfl [vmem:[#allocation1 + $0x8] sm:$0xff pattern:$0x75316420] }
  0x3b   : > { %v330_v28 = vsel %vm301_vm0, %v326_v26, 0.0  ;;  %v337_v29 = vsel %vm301_vm0, %v327_v27, 0.0  ;;  %356 = vst [vmem:[#allocation1] ss:$2 sm:$0xff] %v293_v0 }
  0x3c   : > { %v331_v31 = vrot.slane %v330_v28, 4  ;;  %v338_v32 = vrot.slane %v337_v29, 4 }
  0x3e   : > { %v332_v35 = vadd.f32 %v331_v31, %v330_v28  ;;  %v339_v36 = vadd.f32 %v338_v32, %v337_v29 }
  0x40   : > { %v333_v37 = vrot.slane %v332_v35, 2  ;;  %v340_v38 = vrot.slane %v339_v36, 2 }
  0x42   : > { %v334_v39 = vadd.f32 %v333_v37, %v332_v35  ;;  %v341_v40 = vadd.f32 %v340_v38, %v339_v36  ;;  %v357_v41 = vld.sshfl [vmem:[#allocation1] sm:$0xff pattern:$0x75316420]  ;;  %v358_v42 = vld.sshfl [vmem:[#allocation1 + $0x8] sm:$0xff pattern:$0x75316420] }
  0x43   : > { %v361_v43 = vsel %vm354_vm2, %v357_v41, 0.0  ;;  %v362_v44 = vsel %vm355_vm3, %v358_v42, 0.0 }
  0x44   : > { %v335_v45 = vrot.slane %v334_v39, 1  ;;  %v342_v46 = vrot.slane %v341_v40, 1  ;;  %v363_v47 = vsel %vm301_vm0, %v361_v43, 0.0  ;;  %v370_v48 = vsel %vm301_vm0, %v362_v44, 0.0 }
  0x45   : > { %v364_v49 = vrot.slane %v363_v47, 4  ;;  %v371_v50 = vrot.slane %v370_v48, 4 }
  0x46   : > { %v336_v51 = vadd.f32 %v335_v45, %v334_v39  ;;  %v343_v52 = vadd.f32 %v342_v46, %v341_v40 }
  0x47   : > { %v365_v53 = vadd.f32 %v364_v49, %v363_v47  ;;  %v372_v54 = vadd.f32 %v371_v50, %v370_v48 }
  0x48   : > { %606 = vlog2.f32 %v336_v51 }
  0x49   : > { %608 = vlog2.f32 %v343_v52  ;;  %v366_v55 = vrot.slane %v365_v53, 2  ;;  %v373_v56 = vrot.slane %v372_v54, 2 }
  0x4b   : > { %v374_v57 = vadd.f32 %v373_v56, %v372_v54  ;;  %v367_v58 = vadd.f32 %v366_v55, %v365_v53 }
  0x4d   : > { %v375_v62 = vrot.slane %v374_v57, 1  ;;  %v368_v2 = vrot.slane %v367_v58, 1 }
  0x4e   : > { %v607_v61 = vpop.eup %606 }
  0x4f   : > { %v609_v63 = vpop.eup %608  ;;  %v345_v0 = vmul.f32 0.6931472, %v607_v61  ;;  %v376_v6 = vadd.f32 %v375_v62, %v374_v57  ;;  %v369_v7 = vadd.f32 %v368_v2, %v367_v58 }
  0x50   : > { %v347_v1 = vmul.f32 0.6931472, %v609_v63 }
  0x51   : > { %v348_v4 = vadd.f32 %v345_v0, %v681_v16 }
  0x52   : > { %v349_v5 = vadd.f32 %v347_v1, %v679_v15 }
  0x53   : > { %v394_v9 = vsub.f32 %v348_v4, %v369_v7 }
  0x54   : > { %v395_v8 = vsub.f32 %v349_v5, %v376_v6 }
  0x56   : > { %v398_v10 = vrot.slane %v395_v8, 7 }
  0x58   : > { %v399_v11 = vsel %vm390_vm4, %v394_v9, %v398_v10 }
  0x59   : > { %v401_v12 = vsel %vm393_vm7, %v399_v11, 0.0 }
  0x5a   : > { %vm402_vm8 = vcmp.gt.f32.partialorder %v401_v12, 0.35667494 }
  0x5b   : > { %v404_v17 = vsel %vm402_vm8, %v401_v12, 0.0  ;;  %v574_v16 = vsel %vm402_vm8, 1.0, %v634_v23 }
  0x5c   : > { %v405_v15 = vadd.f32 %v404_v17, %v403_v13  ;;  %v414_v18 = vadd.f32 %v574_v16, %v411_v14 }
  0x5e   : > { %410 = vst.msk [vmem:[%s689_s23] sm:$0x3] %vm696_vm1, %v405_v15 }
  0x5f   : > { %415 = vst.msk [vmem:[%s694_s26] sm:$0x3] %vm696_vm1, %v414_v18 }
  0x60 PF: > { %s14_s14 = sadd.s32 1, %s632_s14   ;;  %s743_s12 = smov %s628_s13 }
  0x61   : > { %p11_p5 = scmp.ge.s32.totalorder %s14_s14, 4   ;;  %s744_s13 = smov %s746_s15 }
  0x63   :  { %13 = sbr.rel (!%p11_p5) target bundleno = 2 (0x2), region = 77 }

</bundles_post_ra>
